<compile_context>
chip_gen: v5e
topology: v5e:2x2
jax: 0.10.0
libtpu: 0.0.40
codegen_flags: <defaults>
</compile_context>

<pallas_src>
import jax
import jax.numpy as jnp
from jax.experimental import pallas as pl
from jax.experimental.pallas import tpu as pltpu

_LANES = 128
_SUBLANES = 8


def _round_up(x, m):
    return ((x + m - 1) // m) * m


def _relative_depth_kernel(img_ref, meta_ref, out_ref):
    # img_ref : (1, R, 128)  f32  flattened, zero-padded image (resident across chunks)
    # meta_ref: (1, TM, 8)   i32  per-point [row_A, lane_A, row_B, lane_B, gt_bits, 0, 0, 0]
    # out_ref : (1, 1, 1)    f32  per-(batch, chunk) partial loss sum
    img = img_ref[0]                     # (R, 128)
    meta = meta_ref[0]                   # (TM, 8)
    R = img.shape[0]
    TM = meta.shape[0]

    row_a = meta[:, 0:1]                 # (TM, 1)
    lane_a = meta[:, 1:2]
    row_b = meta[:, 2:3]
    lane_b = meta[:, 3:4]
    gt = pltpu.bitcast(meta[:, 4:5], jnp.float32)      # (TM, 1)

    # Row-select gather: the one-hot feeds the MXU as LHS; output is only (TM, 128).
    r_iota = jax.lax.broadcasted_iota(jnp.int32, (TM, R), 1)
    oh_a = (r_iota == row_a).astype(jnp.float32)        # (TM, R)
    oh_b = (r_iota == row_b).astype(jnp.float32)
    sel_a = jnp.dot(oh_a, img, preferred_element_type=jnp.float32)   # (TM, 128)
    sel_b = jnp.dot(oh_b, img, preferred_element_type=jnp.float32)

    # Lane-select + a single cross-lane reduce gives d = z_A - z_B per point.
    l_iota = jax.lax.broadcasted_iota(jnp.int32, (TM, _LANES), 1)
    picked = (jnp.where(l_iota == lane_a, sel_a, 0.0)
              - jnp.where(l_iota == lane_b, sel_b, 0.0))              # (TM, 128)
    d = jnp.sum(picked, axis=1, keepdims=True)                        # (TM, 1)

    # Numerically stable softplus: log(1 + exp(-gt * d)) without overflow.
    x = -gt * d
    softplus = jnp.maximum(x, 0.0) + jnp.log(1.0 + jnp.exp(-jnp.abs(x)))
    mask = jnp.abs(gt)
    loss = mask * softplus + (1.0 - mask) * d * d                     # pads -> exactly 0

    out_ref[0] = jnp.sum(loss, axis=0, keepdims=True)                 # (1, 1)


def relative_depth_crit(inp, x_A, y_A, x_B, y_B, ordinal):
    """inp: (B, C, H, W) float (NCHW, only channel 0 used, as in the PyTorch module);
       x_A/y_A/x_B/y_B: (B, N) int; ordinal: (B, N) float in {-1, 0, 1}."""
    B, _, H, W = inp.shape
    N = x_A.shape[-1]
    HW = H * W

    # Image rows of 128 lanes, padded so the sublane dim is a multiple of 8.
    R = _round_up(pl.cdiv(HW, _LANES), _SUBLANES)
    HW_pad = R * _LANES
    N_pad0 = _round_up(max(N, 1), _LANES)

    # ---- point-chunk size TM from this generation's VMEM budget -----------------
    try:
        vmem_cap = int(pltpu.get_tpu_info().vmem_capacity_bytes)
    except Exception:  # pragma: no cover - conservative fallback
        vmem_cap = 64 * 2**20
    budget = min(int(vmem_cap * 0.75), 100 * 2**20)

    # Conservative per-chunk VMEM model (bytes per point of TM):
    #   one-hot construction (~5 arrays of (TM,R))  + double-buffered meta block
    #   + (TM,128) sel/mask temps + ~8 (TM,1)-shaped f32 temps.
    per_point = 20 * R + 2 * _LANES * 4 + 8 * _LANES * 4 + 8 * 512
    fixed = 2 * R * _LANES * 4 + (2 << 20)        # double-buffered image + slack
    tm_fit = max((budget - fixed) // per_point, _LANES)
    TM = int(min((tm_fit // _LANES) * _LANES, N_pad0, 4096))
    TM = max(TM, _LANES)
    T = pl.cdiv(N_pad0, TM)
    TM = _round_up(pl.cdiv(N_pad0, T), _LANES)    # rebalance chunks
    N_pad = T * TM

    est = fixed + TM * per_point
    vmem_limit = int(min(max(budget, est + (8 << 20)), int(vmem_cap * 0.9)))

    # ---- pack inputs -------------------------------------------------------------
    # Image: flatten row-major, zero-pad, reshape lane-dense (B, R, 128).
    img = inp[:, 0].reshape(B, HW).astype(jnp.float32)
    if HW_pad != HW:
        img = jnp.pad(img, ((0, 0), (0, HW_pad - HW)))
    img = img.reshape(B, R, _LANES)

    # Per-point metadata slab: precompute row/lane; gt bitcast into int32.
    flat_a = y_A.astype(jnp.int32) * W + x_A.astype(jnp.int32)
    flat_b = y_B.astype(jnp.int32) * W + x_B.astype(jnp.int32)
    gt = ordinal.astype(jnp.float32)
    zeros = jnp.zeros_like(flat_a)
    meta = jnp.stack(
        [flat_a // _LANES, flat_a % _LANES,
         flat_b // _LANES, flat_b % _LANES,
         jax.lax.bitcast_convert_type(gt, jnp.int32),
         zeros, zeros, zeros], axis=-1)                      # (B, N, 8) int32
    if N_pad != N:
        meta = jnp.pad(meta, ((0, 0), (0, N_pad - N), (0, 0)))   # pads -> loss 0

    partial = pl.pallas_call(
        _relative_depth_kernel,
        out_shape=jax.ShapeDtypeStruct((B, T, 1), jnp.float32),
        grid_spec=pltpu.PrefetchScalarGridSpec(
            num_scalar_prefetch=0,
            grid=(B, T),
            in_specs=[
                # image block index is independent of the chunk axis -> stays resident
                pl.BlockSpec((1, R, _LANES), lambda b, t: (b, 0, 0)),
                pl.BlockSpec((1, TM, 8), lambda b, t: (b, t, 0)),
            ],
            out_specs=pl.BlockSpec((1, 1, 1), lambda b, t: (b, t, 0)),
        ),
        compiler_params=pltpu.CompilerParams(
            dimension_semantics=("parallel", "parallel"),
            vmem_limit_bytes=vmem_limit),
    )(img, meta)

    n_point_total = B * N        # true point count (pads excluded)
    return jnp.sum(partial) / n_point_total


def _reference(inp, x_A, y_A, x_B, y_B, ordinal):
    B, _, H, W = inp.shape
    bidx = jnp.arange(B)[:, None]
    z_A = inp[bidx, 0, y_A, x_A]
    z_B = inp[bidx, 0, y_B, x_B]
    d = z_A - z_B
    mask = jnp.abs(ordinal)
    loss = mask * jnp.log(1.0 + jnp.exp(-ordinal * d)) + (1.0 - mask) * d * d
    return jnp.sum(loss) / (B * x_A.shape[-1])


if __name__ == "__main__":
    key = jax.random.PRNGKey(0)

    ok = True
    for (B, C, H, W, N) in [(2, 1, 16, 16, 8),      # small, N < 128 (padding path)
                            (3, 1, 24, 20, 17),     # HW not a multiple of 128
                            (2, 2, 32, 32, 200)]:   # N > 128, multi-channel input
        key, k1, k2, k3, k4, k5, k6 = jax.random.split(key, 7)
        inp = jax.random.normal(k1, (B, C, H, W), dtype=jnp.float32)
        x_A = jax.random.randint(k2, (B, N), 0, W)
        y_A = jax.random.randint(k3, (B, N), 0, H)
        x_B = jax.random.randint(k4, (B, N), 0, W)
        y_B = jax.random.randint(k5, (B, N), 0, H)
        ordinal = jax.random.randint(k6, (B, N), -1, 2).astype(jnp.float32)

        out = relative_depth_crit(inp, x_A, y_A, x_B, y_B, ordinal)
        out = jax.block_until_ready(out)

        ref = _reference(inp, x_A, y_A, x_B, y_B, ordinal)
        if not jnp.allclose(out, ref, rtol=1e-5, atol=1e-5):
            ok = False
            print("MISMATCH", (B, C, H, W, N), float(out), float(ref))

    assert ok
    print("KERNEL_OK")
</pallas_src>

<mosaic_0001>
module attributes {stable_mosaic.version = 11 : i64} {
  func.func @_relative_depth_kernel(%arg0: i32, %arg1: i32, %arg2: memref<1x8x128xf32, #tpu.memory_space<vmem>>, %arg3: memref<1x128x8xi32, #tpu.memory_space<vmem>>, %arg4: memref<1x1x1xf32, #tpu.memory_space<vmem>>) attributes {dimension_semantics = [#tpu.dimension_semantics<parallel>, #tpu.dimension_semantics<parallel>], iteration_bounds = array<i64: 2, 1>, scalar_prefetch = 0 : i64, scratch_operands = 0 : i64, tpu.core_type = #tpu.core_type<tc>, window_params = [{transform_indices = @transform_0, window_bounds = array<i64: 1, 8, 128>}, {transform_indices = @transform_1, window_bounds = array<i64: 1, 128, 8>}, {transform_indices = @transform_2, window_bounds = array<i64: 1, 1, 1>}]} {
    %c0 = arith.constant 0 : index
    %c0_0 = arith.constant 0 : index
    %c0_1 = arith.constant 0 : index
    %0 = vector.load %arg2[%c0, %c0_0, %c0_1] : memref<1x8x128xf32, #tpu.memory_space<vmem>>, vector<1x8x128xf32>
    %1 = vector.shape_cast %0 : vector<1x8x128xf32> to vector<8x128xf32>
    %c0_2 = arith.constant 0 : index
    %c0_3 = arith.constant 0 : index
    %c0_4 = arith.constant 0 : index
    %2 = vector.load %arg3[%c0_2, %c0_3, %c0_4] : memref<1x128x8xi32, #tpu.memory_space<vmem>>, vector<1x128x8xi32>
    %3 = vector.shape_cast %2 : vector<1x128x8xi32> to vector<128x8xi32>
    %4 = vector.extract_strided_slice %3 {offsets = [0, 0], sizes = [128, 1], strides = [1, 1]} : vector<128x8xi32> to vector<128x1xi32>
    %5 = vector.extract_strided_slice %3 {offsets = [0, 1], sizes = [128, 1], strides = [1, 1]} : vector<128x8xi32> to vector<128x1xi32>
    %6 = vector.extract_strided_slice %3 {offsets = [0, 2], sizes = [128, 1], strides = [1, 1]} : vector<128x8xi32> to vector<128x1xi32>
    %7 = vector.extract_strided_slice %3 {offsets = [0, 3], sizes = [128, 1], strides = [1, 1]} : vector<128x8xi32> to vector<128x1xi32>
    %8 = vector.extract_strided_slice %3 {offsets = [0, 4], sizes = [128, 1], strides = [1, 1]} : vector<128x8xi32> to vector<128x1xi32>
    %9 = tpu.bitcast %8 : vector<128x1xi32> -> vector<128x1xf32>
    %10 = tpu.iota {dimensions = array<i32: 1>} : vector<128x8xi32>
    %11 = vector.broadcast %4 : vector<128x1xi32> to vector<128x8xi32>
    %12 = arith.cmpi eq, %10, %11 : vector<128x8xi32>
    %13 = arith.extui %12 : vector<128x8xi1> to vector<128x8xi32>
    %14 = arith.sitofp %13 : vector<128x8xi32> to vector<128x8xf32>
    %15 = vector.broadcast %6 : vector<128x1xi32> to vector<128x8xi32>
    %16 = arith.cmpi eq, %10, %15 : vector<128x8xi32>
    %17 = arith.extui %16 : vector<128x8xi1> to vector<128x8xi32>
    %18 = arith.sitofp %17 : vector<128x8xi32> to vector<128x8xf32>
    %cst = arith.constant dense<0.000000e+00> : vector<128x128xf32>
    %19 = tpu.matmul %14, %1, %cst {dimension_numbers = #tpu.dot_dimension_numbers<[1], [0], [0], [1], [0, 0, 1, 1], [], []>} : vector<128x8xf32>, vector<8x128xf32>, vector<128x128xf32> -> vector<128x128xf32>
    %cst_5 = arith.constant dense<0.000000e+00> : vector<128x128xf32>
    %20 = tpu.matmul %18, %1, %cst_5 {dimension_numbers = #tpu.dot_dimension_numbers<[1], [0], [0], [1], [0, 0, 1, 1], [], []>} : vector<128x8xf32>, vector<8x128xf32>, vector<128x128xf32> -> vector<128x128xf32>
    %21 = tpu.iota {dimensions = array<i32: 1>} : vector<128x128xi32>
    %22 = vector.broadcast %5 : vector<128x1xi32> to vector<128x128xi32>
    %23 = arith.cmpi eq, %21, %22 : vector<128x128xi32>
    %cst_6 = arith.constant 0.000000e+00 : f32
    %24 = vector.broadcast %cst_6 : f32 to vector<128x128xf32>
    %25 = arith.select %23, %19, %24 : vector<128x128xi1>, vector<128x128xf32>
    %26 = vector.broadcast %7 : vector<128x1xi32> to vector<128x128xi32>
    %27 = arith.cmpi eq, %21, %26 : vector<128x128xi32>
    %cst_7 = arith.constant 0.000000e+00 : f32
    %28 = vector.broadcast %cst_7 : f32 to vector<128x128xf32>
    %29 = arith.select %27, %20, %28 : vector<128x128xi1>, vector<128x128xf32>
    %30 = arith.subf %25, %29 : vector<128x128xf32>
    %cst_8 = arith.constant dense<0.000000e+00> : vector<128xf32>
    %31 = vector.multi_reduction <add>, %30, %cst_8 [1] : vector<128x128xf32> to vector<128xf32>
    %32 = vector.shape_cast %31 : vector<128xf32> to vector<128x1xf32>
    %cst_9 = arith.constant 0.000000e+00 : f32
    %33 = vector.broadcast %cst_9 : f32 to vector<128x1xf32>
    %34 = arith.subf %33, %9 : vector<128x1xf32>
    %35 = arith.mulf %34, %32 : vector<128x1xf32>
    %cst_10 = arith.constant 0.000000e+00 : f32
    %36 = vector.broadcast %cst_10 : f32 to vector<128x1xf32>
    %37 = arith.maximumf %35, %36 : vector<128x1xf32>
    %38 = math.absf %35 : vector<128x1xf32>
    %cst_11 = arith.constant 0.000000e+00 : f32
    %39 = vector.broadcast %cst_11 : f32 to vector<128x1xf32>
    %40 = arith.subf %39, %38 : vector<128x1xf32>
    %41 = math.exp %40 : vector<128x1xf32>
    %cst_12 = arith.constant 1.000000e+00 : f32
    %42 = vector.broadcast %cst_12 : f32 to vector<128x1xf32>
    %43 = arith.addf %42, %41 : vector<128x1xf32>
    %44 = math.log %43 : vector<128x1xf32>
    %45 = arith.addf %37, %44 : vector<128x1xf32>
    %46 = math.absf %9 : vector<128x1xf32>
    %47 = arith.mulf %46, %45 : vector<128x1xf32>
    %cst_13 = arith.constant 1.000000e+00 : f32
    %48 = vector.broadcast %cst_13 : f32 to vector<128x1xf32>
    %49 = arith.subf %48, %46 : vector<128x1xf32>
    %50 = arith.mulf %49, %32 : vector<128x1xf32>
    %51 = arith.mulf %50, %32 : vector<128x1xf32>
    %52 = arith.addf %47, %51 : vector<128x1xf32>
    %cst_14 = arith.constant dense<0.000000e+00> : vector<1xf32>
    %53 = vector.multi_reduction <add>, %52, %cst_14 [0] : vector<128x1xf32> to vector<1xf32>
    %54 = vector.shape_cast %53 : vector<1xf32> to vector<1x1xf32>
    %c0_15 = arith.constant 0 : index
    %c0_16 = arith.constant 0 : index
    %c0_17 = arith.constant 0 : index
    %55 = vector.load %arg4[%c0_15, %c0_16, %c0_17] : memref<1x1x1xf32, #tpu.memory_space<vmem>>, vector<1x1x1xf32>
    %56 = vector.shape_cast %55 : vector<1x1x1xf32> to vector<1x1xf32>
    %57 = vector.shape_cast %54 : vector<1x1xf32> to vector<1x1x1xf32>
    tpu.vector_store %arg4[%c0_15, %c0_16, %c0_17], %57 {strides = array<i32>} : memref<1x1x1xf32, #tpu.memory_space<vmem>>, vector<1x1x1xf32>,
    return
  }
  func.func @transform_0(%arg0: i32, %arg1: i32) -> (i32, i32, i32) {
    %c0_i32 = arith.constant 0 : i32
    %c0_i32_0 = arith.constant 0 : i32
    %c0_i32_1 = arith.constant 0 : i32
    return %arg0, %c0_i32, %c0_i32_0 : i32, i32, i32
  }
  func.func @transform_1(%arg0: i32, %arg1: i32) -> (i32, i32, i32) {
    %c0_i32 = arith.constant 0 : i32
    %c0_i32_0 = arith.constant 0 : i32
    return %arg0, %arg1, %c0_i32 : i32, i32, i32
  }
  func.func @transform_2(%arg0: i32, %arg1: i32) -> (i32, i32, i32) {
    %c0_i32 = arith.constant 0 : i32
    %c0_i32_0 = arith.constant 0 : i32
    return %arg0, %arg1, %c0_i32 : i32, i32, i32
  }
}

</mosaic_0001>

<bundles_post_ra>
// kernel: tpu_custom_call.1
= control target key start
LH: loop header
LB: loop body
LE: loop exit
PB: predicated region body
PF: predicated region fallthrough
CT: control target
= control target key end

     0   :  { %s1493_s9 = smov 0   ;;  %s1495_s10 = smov 0   ;;  %s2101_s0 = inlined_call_operand.vmem [shape: f32[2,8,128], index: 0, kind: input, shape index: {}]   ;;  %s2102_s1 = inlined_call_operand.vmem [shape: s32[2,128,8], index: 1, kind: input, shape index: {}]   ;;  %s2103_s2 = inlined_call_operand.vmem [shape: f32[2,1,1], index: 2, kind: output, shape index: {}]  }
   0x1   :  { %s1497_s11 = smov 0  }
   0x2 LB: > { %s24_s12 = sadd.s32 1, %s1466_s10  ;;  %p1258_p0 = scmp.ge.s32.totalorder %s1470_s11, 1  ;;  %s1470_s11 = sphi %s1497_s11, %s12_s11   ;;  %s1466_s10 = sphi %s1495_s10, %s2121_s10   ;;  %s1462_s9 = sphi %s1493_s9, %s2120_s9  }
   0x3   : > { %p26_p1 = scmp.ge.s32.totalorder %s24_s12, 2  ;;  %p142_p2 = scmp.lt.s32.totalorder %s1470_s11, 3 }
   0x5   : > { %s2123_s12 = smov (%p26_p1, %s24_s12), 0  ;;  %p143_p3 = pnand %p1258_p0, %p142_p2 }
   0x6   : > { %p173_p4 = scmp.lt.s32.totalorder (!%p143_p3), %s1462_s9, 1  ;;  %s1477_s21 = smov (!%p143_p3), 124  }
   0x7   : > { %146 = sbr.rel (%p143_p3) target bundleno = 659 (0x293), region = 28 }
   0xc   : > { %v1472_v0 = vmov 0   ;;  %s2125_s9 = smov (!%p173_p4, %s1462_s9), 1  ;;  %v1473_v15 = vmov 2   ;;  %v1474_v18 = vmov 1   ;;  %v226_v22 = vlaneseq }
   0xd   : > { %1363 = vset.pattern.permute.xlu2 %v1472_v0  ;;  %1362 = vset.pattern.permute.xlu1 %v1472_v0  ;;  %s1328_s13 = sshll.u32 %s2125_s9, 7  ;;  %s1259_s17 = sshll.u32 %s2125_s9, 3  ;;  %vm420_vm0 = vcmask 64512   ;;  %v1475_v25 = vmov 0.0   ;;  %v1476_v30 = vmov 3  }
   0xe   : > { %1361 = vset.pattern.permute.xlu0 %v1472_v0  ;;  %s1517_s16 = scalar_lea.vmem %s2102_s1, %s1328_s13  ;;  %s176_s20 = scalar_lea.vmem %s2101_s0, %s1259_s17  ;;  %v1617_v23 = vand.u32 127, %v226_v22 }
   0xf   : > { %v1520_v1 = vld [vmem:[%s1517_s16 + $0x20] sm:$0xff]  ;;  %v1523_v2 = vld [vmem:[%s1517_s16 + $0x10] sm:$0xff]  ;;  %v1532_v4 = vld [vmem:[%s1517_s16 + $0x28] sm:$0xff]  ;;  %s192_s24 = scalar_lea.vmem %s2103_s2, %s2125_s9 }
  0x10   : > { %v1526_v3 = vld [vmem:[%s1517_s16] sm:$0xff]  ;;  %241 = vperm.xlu2 %1363, %v1520_v1   ;;  %235 = vperm.xlu1 %1362, %v1523_v2   ;;  %v1535_v5 = vld [vmem:[%s1517_s16 + $0x18] sm:$0xff]  ;;  %v1538_v6 = vld [vmem:[%s1517_s16 + $0x8] sm:$0xff] }
  0x11   : > { %229 = vperm.xlu0 %1361, %v1526_v3   ;;  %v1544_v7 = vld [vmem:[%s1517_s16 + $0x40] sm:$0xff]  ;;  %v1547_v8 = vld [vmem:[%s1517_s16 + $0x38] sm:$0xff]  ;;  %v1550_v9 = vld [vmem:[%s1517_s16 + $0x30] sm:$0xff] }
  0x12   : > { %v1556_v10 = vld [vmem:[%s1517_s16 + $0x58] sm:$0xff]  ;;  %v1559_v11 = vld [vmem:[%s1517_s16 + $0x50] sm:$0xff]  ;;  %v1562_v12 = vld [vmem:[%s1517_s16 + $0x48] sm:$0xff] }
  0x13   : > { %v1568_v13 = vld [vmem:[%s1517_s16 + $0x68] sm:$0xff]  ;;  %v1571_v14 = vld [vmem:[%s1517_s16 + $0x60] sm:$0xff]  ;;  %v1589_v16 = vld [vmem:[%s1517_s16 + $0x70] sm:$0xff] }
  0x14   : > { %v1596_v17 = vld [vmem:[%s1517_s16 + $0x78] sm:$0xff]  ;;  %v193_v19 = vld [vmem:[%s176_s20] sm:$0xff] }
  0x15   : > { %484 = vmatpush.msra.mxu0 %v193_v19  ;;  %1329 = vmatpush.msra.mxu2 %v193_v19 }
  0x16   : > { %597 = vmatpush.msra.mxu1 %v193_v19  ;;  %1330 = vmatpush.msra.mxu3 %v193_v19 }
  0x18   : > { %244 = vperm.xlu2 %1363, %v1532_v4   ;;  %238 = vperm.xlu1 %1362, %v1535_v5  }
  0x19   : > { %232 = vperm.xlu0 %1361, %v1538_v6  }
  0x20   : > { %253 = vperm.xlu2 %1363, %v1544_v7   ;;  %250 = vperm.xlu1 %1362, %v1547_v8  }
  0x21   : > { %247 = vperm.xlu0 %1361, %v1550_v9  }
  0x28   : > { %262 = vperm.xlu2 %1363, %v1556_v10   ;;  %259 = vperm.xlu1 %1362, %v1559_v11  }
  0x29   : > { %256 = vperm.xlu0 %1361, %v1562_v12  }
  0x30   : > { %1364 = vset.pattern.permute.xlu2 %v1473_v15  ;;  %268 = vperm.xlu1 %1362, %v1568_v13  }
  0x31   : > { %265 = vperm.xlu0 %1361, %v1571_v14   ;;  %325 = vperm.xlu2 %1364, %v1526_v3  }
  0x38   : > { %1366 = vset.pattern.permute.xlu1 %v1473_v15 }
  0x39   : > { %1365 = vset.pattern.permute.xlu0 %v1473_v15  ;;  %349 = vperm.xlu1 %1366, %v1544_v7  }
  0x3a   : > { %331 = vperm.xlu2 %1364, %v1523_v2   ;;  %328 = vperm.xlu0 %1365, %v1538_v6  }
  0x41   : > { %352 = vperm.xlu1 %1366, %v1562_v12  }
  0x42   : > { %334 = vperm.xlu2 %1364, %v1535_v5   ;;  %355 = vperm.xlu0 %1365, %v1559_v11  }
  0x49   : > { %337 = vperm.xlu1 %1366, %v1520_v1  }
  0x4a   : > { %358 = vperm.xlu2 %1364, %v1556_v10   ;;  %340 = vperm.xlu0 %1365, %v1532_v4  }
  0x51   : > { %361 = vperm.xlu1 %1366, %v1571_v14  }
  0x52   : > { %343 = vperm.xlu2 %1364, %v1550_v9   ;;  %364 = vperm.xlu0 %1365, %v1568_v13  }
  0x59   : > { %346 = vperm.xlu1 %1366, %v1547_v8  }
  0x5a   : > { %367 = vperm.xlu0 %1365, %v1589_v16   ;;  %1367 = vset.pattern.permute.xlu2 %v1472_v0 }
  0x5b   : > { %271 = vperm.xlu2 %1367, %v1589_v16  }
  0x61   : > { %1368 = vset.pattern.permute.xlu1 %v1472_v0 }
  0x62   : > { %274 = vperm.xlu1 %1368, %v1596_v17   ;;  %1370 = vset.pattern.permute.xlu0 %v1474_v18 }
  0x63   : > { %648 = vperm.xlu0 %1370, %v1526_v3   ;;  %1369 = vset.pattern.permute.xlu2 %v1473_v15 }
  0x64   : > { %370 = vperm.xlu2 %1369, %v1596_v17  }
  0x6a   : > { %v1605_v20 = vpop.permute.xlu2 %241  ;;  %1371 = vset.pattern.permute.xlu1 %v1474_v18 }
  0x6b   : > { %651 = vperm.xlu1 %1371, %v1538_v6   ;;  %663 = vperm.xlu0 %1370, %v1532_v4   ;;  %vm280_vm8 = vcmp.eq.s32.totalorder %v1617_v23, %v1605_v20 }
  0x6c   : > { %1372 = vset.pattern.permute.xlu2 %v1474_v18  ;;  %v1266_v48 = vsel %vm280_vm8, 1.0, %v1475_v25 }
  0x6d   : > { %654 = vperm.xlu2 %1372, %v1523_v2  }
  0x72   : > { %v1612_v21 = vpop.permute.xlu2 %244 }
  0x73   : > { %657 = vperm.xlu1 %1371, %v1535_v5   ;;  %672 = vperm.xlu0 %1370, %v1544_v7   ;;  %vm281_vm10 = vcmp.eq.s32.totalorder %v1617_v23, %v1612_v21 }
  0x74   : > { %v1267_v53 = vsel %vm281_vm10, 1.0, %v1475_v25 }
  0x75   : > { %660 = vperm.xlu2 %1372, %v1520_v1  }
  0x7a   : > { %v254_v24 = vpop.permute.xlu2 %253 }
  0x7b   : > { %vm284_vm1 = vcmp.eq.s32.totalorder %v1617_v23, %v254_v24  ;;  %666 = vperm.xlu1 %1371, %v1550_v9   ;;  %681 = vperm.xlu0 %1370, %v1556_v10  }
  0x7c   : > { %v1270_v26 = vsel %vm284_vm1, 1.0, %v1475_v25 }
  0x7d   : > { %1302 = vmatmul.msk.f32.vlgmr.msra.gmra.mxu2 %vm420_vm0, %v1270_v26  ;;  %669 = vperm.xlu2 %1372, %v1547_v8  }
  0x82   : > { %v1625_v27 = vpop.permute.xlu2 %262  ;;  %v236_v28 = vpop.permute.xlu1 %235 }
  0x83   : > { %v230_v29 = vpop.permute.xlu0 %229  ;;  %675 = vperm.xlu1 %1371, %v1562_v12   ;;  %1375 = vset.pattern.permute.xlu0 %v1476_v30  ;;  %vm278_vm5 = vcmp.eq.s32.totalorder %v1617_v23, %v236_v28  ;;  %vm287_vm11 = vcmp.eq.s32.totalorder %v1617_v23, %v1625_v27 }
  0x84   : > { %vm276_vm2 = vcmp.eq.s32.totalorder %v1617_v23, %v230_v29  ;;  %728 = vperm.xlu0 %1375, %v1526_v3   ;;  %v1264_v39 = vsel %vm278_vm5, 1.0, %v1475_v25  ;;  %v1273_v54 = vsel %vm287_vm11, 1.0, %v1475_v25 }
  0x85   : > { %v1262_v31 = vsel %vm276_vm2, 1.0, %v1475_v25  ;;  %678 = vperm.xlu2 %1372, %v1559_v11  }
  0x86   : > { %1294 = vmatmul.msk.f32.vlgmr.msra.gmra.mxu0 %vm420_vm0, %v1262_v31 }
  0x8a   : > { %v239_v32 = vpop.permute.xlu1 %238 }
  0x8b   : > { %v233_v33 = vpop.permute.xlu0 %232  ;;  %v326_v34 = vpop.permute.xlu2 %325  ;;  %1373 = vset.pattern.permute.xlu1 %v1476_v30  ;;  %vm279_vm6 = vcmp.eq.s32.totalorder %v1617_v23, %v239_v32 }
  0x8c   : > { %vm277_vm3 = vcmp.eq.s32.totalorder %v1617_v23, %v233_v33  ;;  %vm372_vm4 = vcmp.eq.s32.totalorder %v1617_v23, %v326_v34  ;;  %731 = vperm.xlu1 %1373, %v1538_v6   ;;  %743 = vperm.xlu0 %1375, %v1532_v4   ;;  %v1265_v43 = vsel %vm279_vm6, 1.0, %v1475_v25 }
  0x8d   : > { %v1263_v35 = vsel %vm277_vm3, 1.0, %v1475_v25  ;;  %v1278_v36 = vsel %vm372_vm4, 1.0, %v1475_v25  ;;  %1374 = vset.pattern.permute.xlu2 %v1476_v30 }
  0x8e   : > { %1295 = vmatmul.msk.f32.gmra.mxu0 %vm420_vm0, %v1263_v35  ;;  %1310 = vmatmul.msk.f32.vlgmr.msra.gmra.mxu1 %vm420_vm0, %v1278_v36 }
  0x8f   : > { %734 = vperm.xlu2 %1374, %v1523_v2  }
  0x92   : > { %v1646_v37 = vpop.permute.xlu1 %250 }
  0x93   : > { %v248_v38 = vpop.permute.xlu0 %247  ;;  %vm283_vm3 = vcmp.eq.s32.totalorder %v1617_v23, %v1646_v37 }
  0x94   : > { %737 = vperm.xlu1 %1373, %v1535_v5   ;;  %752 = vperm.xlu0 %1375, %v1544_v7   ;;  %v332_v40 = vpop.permute.xlu2 %331  ;;  %vm282_vm14 = vcmp.eq.s32.totalorder %v1617_v23, %v248_v38 }
  0x95   : > { %vm374_vm1 = vcmp.eq.s32.totalorder %v1617_v23, %v332_v40  ;;  %v1268_v58 = vsel %vm282_vm14, 1.0, %v1475_v25 }
  0x96   : > { %1296 = vmatmul.msk.f32.gmra.mxu0 %vm420_vm0, %v1264_v39  ;;  %v1280_v62 = vsel %vm374_vm1, 1.0, %v1475_v25 }
  0x97   : > { %740 = vperm.xlu2 %1374, %v1520_v1  }
  0x9a   : > { %v260_v41 = vpop.permute.xlu1 %259 }
  0x9b   : > { %v257_v42 = vpop.permute.xlu0 %256  ;;  %vm286_vm9 = vcmp.eq.s32.totalorder %v1617_v23, %v260_v41 }
  0x9c   : > { %vm285_vm7 = vcmp.eq.s32.totalorder %v1617_v23, %v257_v42  ;;  %746 = vperm.xlu1 %1373, %v1550_v9   ;;  %767 = vperm.xlu0 %1375, %v1568_v13   ;;  %v335_v45 = vpop.permute.xlu2 %334  ;;  %v1272_v49 = vsel %vm286_vm9, 1.0, %v1475_v25 }
  0x9d   : > { %v1271_v44 = vsel %vm285_vm7, 1.0, %v1475_v25  ;;  %vm375_vm5 = vcmp.eq.s32.totalorder %v1617_v23, %v335_v45 }
  0x9e   : > { %1297 = vmatmul.msk.f32.gmra.mxu0 %vm420_vm0, %v1265_v43  ;;  %1303 = vmatmul.msk.f32.gmra.mxu2 %vm420_vm0, %v1271_v44 }
  0x9f   : > { %749 = vperm.xlu2 %1374, %v1547_v8  }
  0xa2   : > { %v269_v46 = vpop.permute.xlu1 %268 }
  0xa3   : > { %v266_v47 = vpop.permute.xlu0 %265  ;;  %vm289_vm4 = vcmp.eq.s32.totalorder %v1617_v23, %v269_v46 }
  0xa4   : > { %755 = vperm.xlu1 %1373, %v1562_v12   ;;  %v359_v50 = vpop.permute.xlu2 %358  ;;  %vm288_vm15 = vcmp.eq.s32.totalorder %v1617_v23, %v266_v47 }
  0xa5   : > { %v1274_v59 = vsel %vm288_vm15, 1.0, %v1475_v25  ;;  %vm383_vm8 = vcmp.eq.s32.totalorder %v1617_v23, %v359_v50 }
  0xa6   : > { %1298 = vmatmul.msk.f32.gmra.mxu0 %vm420_vm0, %v1266_v48  ;;  %1304 = vmatmul.msk.f32.gmra.mxu2 %vm420_vm0, %v1272_v49  ;;  %v1289_v22 = vsel %vm383_vm8, 1.0, %v1475_v25 }
  0xa7   : > { %758 = vperm.xlu2 %1374, %v1559_v11   ;;  %v1269_v11 = vsel %vm283_vm3, 1.0, %v1475_v25 }
  0xab   : > { %v350_v51 = vpop.permute.xlu1 %349 }
  0xac   : > { %vm380_vm12 = vcmp.eq.s32.totalorder %v1617_v23, %v350_v51  ;;  %v329_v52 = vpop.permute.xlu0 %328  ;;  %761 = vperm.xlu1 %1373, %v1556_v10   ;;  %v344_v60 = vpop.permute.xlu2 %343 }
  0xad   : > { %v1286_v55 = vsel %vm380_vm12, 1.0, %v1475_v25  ;;  %vm373_vm13 = vcmp.eq.s32.totalorder %v1617_v23, %v329_v52  ;;  %vm378_vm12 = vcmp.eq.s32.totalorder %v1617_v23, %v344_v60 }
  0xae   : > { %v1279_v56 = vsel %vm373_vm13, 1.0, %v1475_v25  ;;  %1299 = vmatmul.msk.f32.gmra.mxu0 %vm420_vm0, %v1267_v53  ;;  %1305 = vmatmul.msk.f32.gmra.mxu2 %vm420_vm0, %v1273_v54 }
  0xaf   : > { %1311 = vmatmul.msk.f32.gmra.mxu1 %vm420_vm0, %v1279_v56  ;;  %1318 = vmatmul.msk.f32.vlgmr.msra.gmra.mxu3 %vm420_vm0, %v1286_v55 }
  0xb0   : > { %1376 = vset.pattern.permute.xlu2 %v1474_v18 }
  0xb1   : > { %684 = vperm.xlu2 %1376, %v1571_v14  }
  0xb3   : > { %v353_v57 = vpop.permute.xlu1 %352 }
  0xb4   : > { %vm381_vm2 = vcmp.eq.s32.totalorder %v1617_v23, %v353_v57  ;;  %764 = vperm.xlu1 %1373, %v1571_v14   ;;  %v356_v63 = vpop.permute.xlu0 %355  ;;  %v1275_v14 = vsel %vm289_vm4, 1.0, %v1475_v25 }
  0xb5   : > { %v1287_v61 = vsel %vm381_vm2, 1.0, %v1475_v25  ;;  %vm382_vm6 = vcmp.eq.s32.totalorder %v1617_v23, %v356_v63  ;;  %v272_v15 = vpop.permute.xlu2 %271 }
  0xb6   : > { %1300 = vmatmul.msk.f32.gmra.mxu0 %vm420_vm0, %v1268_v58  ;;  %1306 = vmatmul.msk.f32.gmra.mxu2 %vm420_vm0, %v1274_v59  ;;  %v1288_v19 = vsel %vm382_vm6, 1.0, %v1475_v25  ;;  %vm290_vm7 = vcmp.eq.s32.totalorder %v1617_v23, %v272_v15 }
  0xb7   : > { %1312 = vmatmul.msk.f32.gmra.mxu1 %vm420_vm0, %v1280_v62  ;;  %1319 = vmatmul.msk.f32.gmra.mxu3 %vm420_vm0, %v1287_v61  ;;  %v1276_v21 = vsel %vm290_vm7, 1.0, %v1475_v25 }
  0xb9   : > { %687 = vperm.xlu2 %1376, %v1568_v13   ;;  %v1281_v13 = vsel %vm375_vm5, 1.0, %v1475_v25 }
  0xbb   : > { %v338_v0 = vpop.permute.xlu1 %337 }
  0xbc   : > { %1377 = vset.pattern.permute.xlu1 %v1474_v18  ;;  %v341_v18 = vpop.permute.xlu0 %340  ;;  %vm376_vm9 = vcmp.eq.s32.totalorder %v1617_v23, %v338_v0 }
  0xbd   : > { %690 = vperm.xlu1 %1377, %v1589_v16   ;;  %v1282_v24 = vsel %vm376_vm9, 1.0, %v1475_v25  ;;  %vm377_vm10 = vcmp.eq.s32.totalorder %v1617_v23, %v341_v18 }
  0xbe   : > { %1301 = vmatmul.msk.f32.gmra.mxu0 %vm420_vm0, %v1269_v11  ;;  %1307 = vmatmul.msk.f32.gmra.mxu2 %vm420_vm0, %v1275_v14  ;;  %v1283_v28 = vsel %vm377_vm10, 1.0, %v1475_v25  ;;  %v371_v36 = vpop.permute.xlu2 %370 }
  0xbf   : > { %1313 = vmatmul.msk.f32.gmra.mxu1 %vm420_vm0, %v1281_v13  ;;  %1320 = vmatmul.msk.f32.gmra.mxu3 %vm420_vm0, %v1288_v19  ;;  %vm387_vm2 = vcmp.eq.s32.totalorder %v1617_v23, %v371_v36 }
  0xc0   : > { %v1293_v38 = vsel %vm387_vm2, 1.0, %v1475_v25 }
  0xc1   : > { %1378 = vset.pattern.permute.xlu2 %v1476_v30 }
  0xc2   : > { %770 = vperm.xlu2 %1378, %v1589_v16  }
  0xc3   : > { %v362_v20 = vpop.permute.xlu1 %361 }
  0xc4   : > { %vm384_vm11 = vcmp.eq.s32.totalorder %v1617_v23, %v362_v20  ;;  %v365_v26 = vpop.permute.xlu0 %364 }
  0xc5   : > { %693 = vperm.xlu1 %1377, %v1596_v17   ;;  %v1290_v29 = vsel %vm384_vm11, 1.0, %v1475_v25  ;;  %vm385_vm13 = vcmp.eq.s32.totalorder %v1617_v23, %v365_v26 }
  0xc6   : > { %1308 = vmatmul.msk.f32.gmra.mxu2 %vm420_vm0, %v1276_v21  ;;  %v1291_v31 = vsel %vm385_vm13, 1.0, %v1475_v25 }
  0xc7   : > { %1314 = vmatmul.msk.f32.gmra.mxu1 %vm420_vm0, %v1282_v24  ;;  %1321 = vmatmul.msk.f32.gmra.mxu3 %vm420_vm0, %v1289_v22  ;;  %v655_v42 = vpop.permute.xlu2 %654 }
  0xc8   : > { %vm697_vm6 = vcmp.eq.s32.totalorder %v1617_v23, %v655_v42 }
  0xca   : > { %773 = vperm.xlu2 %1378, %v1596_v17   ;;  %v1284_v17 = vsel %vm378_vm12, 1.0, %v1475_v25 }
  0xcb   : > { %v347_v27 = vpop.permute.xlu1 %346 }
  0xcc   : > { %v368_v32 = vpop.permute.xlu0 %367  ;;  %vm379_vm15 = vcmp.eq.s32.totalorder %v1617_v23, %v347_v27 }
  0xcd   : > { %vm386_vm1 = vcmp.eq.s32.totalorder %v1617_v23, %v368_v32  ;;  %v1285_v34 = vsel %vm379_vm15, 1.0, %v1475_v25 }
  0xce   : > { %v1292_v35 = vsel %vm386_vm1, 1.0, %v1475_v25 }
  0xcf   : > { %1315 = vmatmul.msk.f32.gmra.mxu1 %vm420_vm0, %v1283_v28  ;;  %1322 = vmatmul.msk.f32.gmra.mxu3 %vm420_vm0, %v1290_v29  ;;  %v661_v45 = vpop.permute.xlu2 %660 }
  0xd0   : > { %vm699_vm10 = vcmp.eq.s32.totalorder %v1617_v23, %v661_v45 }
  0xd4   : > { %v275_v30 = vpop.permute.xlu1 %274 }
  0xd5   : > { %vm291_vm14 = vcmp.eq.s32.totalorder %v1617_v23, %v275_v30  ;;  %v649_v37 = vpop.permute.xlu0 %648 }
  0xd6   : > { %v1277_v33 = vsel %vm291_vm14, 1.0, %v1475_v25  ;;  %vm695_vm3 = vcmp.eq.s32.totalorder %v1617_v23, %v649_v37 }
  0xd7   : > { %1316 = vmatmul.msk.f32.gmra.mxu1 %vm420_vm0, %v1284_v17  ;;  %1323 = vmatmul.msk.f32.gmra.mxu3 %vm420_vm0, %v1291_v31  ;;  %v1764_v52 = vpop.permute.xlu2 %669 }
  0xd8   : > { %1309 = vmatmul.msk.f32.gmra.mxu2 %vm420_vm0, %v1277_v33 }
  0xdd   : > { %v1754_v39 = vpop.permute.xlu0 %663  ;;  %v652_v41 = vpop.permute.xlu1 %651 }
  0xde   : > { %vm700_vm12 = vcmp.eq.s32.totalorder %v1617_v23, %v1754_v39 }
  0xdf   : > { %1317 = vmatmul.msk.f32.gmra.mxu1 %vm420_vm0, %v1285_v34  ;;  %1324 = vmatmul.msk.f32.gmra.mxu3 %vm420_vm0, %v1292_v35  ;;  %v1768_v54 = vpop.permute.xlu2 %678 }
  0xe5   : > { %v1756_v40 = vpop.permute.xlu0 %672  ;;  %v658_v44 = vpop.permute.xlu1 %657 }
  0xe6   : > { %vm698_vm8 = vcmp.eq.s32.totalorder %v1617_v23, %v658_v44  ;;  %vm703_vm15 = vcmp.eq.s32.totalorder %v1617_v23, %v1756_v40 }
  0xe7   : > { %1325 = vmatmul.msk.f32.gmra.mxu3 %vm420_vm0, %v1293_v38  ;;  %vm696_vm0 = vcmp.eq.s32.totalorder %v1617_v23, %v652_v41 }
  0xe9   : > { %v735_v57 = vpop.permute.xlu2 %734 }
  0xea   : > { %vm777_vm7 = vcmp.eq.s32.totalorder %v1617_v23, %v735_v57 }
  0xed   : > { %v1758_v43 = vpop.permute.xlu0 %681  ;;  %v1762_v51 = vpop.permute.xlu1 %666 }
  0xee   : > { %vm701_vm1 = vcmp.eq.s32.totalorder %v1617_v23, %v1762_v51 }
  0xf1   : > { %v741_v63 = vpop.permute.xlu2 %740 }
  0xf2   : > { %vm779_vm11 = vcmp.eq.s32.totalorder %v1617_v23, %v741_v63 }
  0xf5   : > { %v1766_v53 = vpop.permute.xlu1 %675 }
  0xf6   : > { %v729_v46 = vpop.permute.xlu0 %728 }
  0xf7   : > { %vm775_vm4 = vcmp.eq.s32.totalorder %v1617_v23, %v729_v46 }
  0xf9   : > { %v1778_v24 = vpop.permute.xlu2 %749 }
  0xfe   : > { %v732_v56 = vpop.permute.xlu1 %731  ;;  %v744_v35 = vpop.permute.xlu0 %743 }
  0xff   : > { %vm776_vm5 = vcmp.eq.s32.totalorder %v1617_v23, %v732_v56  ;;  %vm780_vm13 = vcmp.eq.s32.totalorder %v1617_v23, %v744_v35 }
 0x100   : > { %v1770_v58 = vpop.f32.mrf.mxu2 }
 0x101   : > { %v1784_v33 = vpop.permute.xlu2 %758 }
 0x103   : > { %v486_v47 = vpop.f32.mrf.mxu0 }
 0x104   : > { %v711_v25 = vsel %vm695_vm3, %v486_v47, 0.0 }
 0x106   : > { %v738_v62 = vpop.permute.xlu1 %737  ;;  %v753_v45 = vpop.permute.xlu0 %752 }
 0x107   : > { %vm778_vm9 = vcmp.eq.s32.totalorder %v1617_v23, %v738_v62  ;;  %vm783_vm14 = vcmp.eq.s32.totalorder %v1617_v23, %v753_v45 }
 0x10b   : > { %v599_v48 = vpop.f32.mrf.mxu1  ;;  %v489_v55 = vpop.f32.mrf.mxu0 }
 0x10c   : > { %v791_v49 = vsel %vm775_vm4, %v599_v48, 0.0  ;;  %v712_v61 = vsel %vm696_vm0, %v489_v55, 0.0  ;;  %v685_v48 = vpop.permute.xlu2 %684  ;;  %vm706_vm0 = vcmp.eq.s32.totalorder %v1617_v23, %v1758_v43 }
 0x10d   : > { %v807_v50 = vsub.f32 %v711_v25, %v791_v49 }
 0x10e   : > { %v747_v22 = vpop.permute.xlu1 %746 }
 0x10f   : > { %823 = vadd.xlane.f32.xlu0 %v807_v50  ;;  %vm781_vm2 = vcmp.eq.s32.totalorder %v1617_v23, %v747_v22 }
 0x113   : > { %v492_v59 = vpop.f32.mrf.mxu0 }
 0x114   : > { %v713_v18 = vsel %vm697_vm6, %v492_v59, 0.0  ;;  %vm702_vm6 = vcmp.eq.s32.totalorder %v1617_v23, %v1764_v52 }
 0x116   : > { %v756_v32 = vpop.permute.xlu1 %755 }
 0x117   : > { %vm784_vm3 = vcmp.eq.s32.totalorder %v1617_v23, %v756_v32 }
 0x11b   : > { %v495_v15 = vpop.f32.mrf.mxu0 }
 0x11c   : > { %v714_v30 = vsel %vm698_vm8, %v495_v15, 0.0 }
 0x11e   : > { %v762_v47 = vpop.permute.xlu1 %761 }
 0x11f   : > { %vm786_vm4 = vcmp.eq.s32.totalorder %v1617_v23, %v762_v47  ;;  %v768_v47 = vpop.permute.xlu0 %767 }
 0x121   : > { %v1774_v14 = vpop.f32.mrf.mxu2 }
 0x123   : > { %v498_v28 = vpop.f32.mrf.mxu0 }
 0x124   : > { %v715_v38 = vsel %vm699_vm10, %v498_v28, 0.0 }
 0x126   : > { %v765_v63 = vpop.permute.xlu1 %764 }
 0x127   : > { %vm787_vm10 = vcmp.eq.s32.totalorder %v1617_v23, %v765_v63  ;;  %v857_v63 = vsub.f32 0.0, %v1523_v2 }
 0x129   : > { %v1780_v26 = vpop.f32.mrf.mxu2 }
 0x12b   : > { %v501_v42 = vpop.f32.mrf.mxu0 }
 0x12c   : > { %v602_v60 = vpop.f32.mrf.mxu1  ;;  %v716_v49 = vsel %vm700_vm12, %v501_v42, 0.0  ;;  %vm785_vm12 = vcmp.eq.s32.totalorder %v1617_v23, %v1784_v33 }
 0x12d   : > { %v792_v0 = vsel %vm776_vm5, %v602_v60, 0.0  ;;  %vm704_vm5 = vcmp.eq.s32.totalorder %v1617_v23, %v1766_v53 }
 0x12e   : > { %v808_v11 = vsub.f32 %v712_v61, %v792_v0  ;;  %v719_v61 = vsel %vm703_vm15, %v1770_v58, 0.0  ;;  %v1800_v0 = vpop.permute.xlu2 %687 }
 0x130   : > { %825 = vadd.xlane.f32.xlu1 %v808_v11 }
 0x131   : > { %v519_v36 = vpop.f32.mrf.mxu2 }
 0x132   : > { %v623_v13 = vpop.f32.mrf.mxu3  ;;  %v722_v22 = vsel %vm706_vm0, %v519_v36, 0.0 }
 0x133   : > { %v504_v57 = vpop.f32.mrf.mxu0  ;;  %v799_v39 = vsel %vm783_vm14, %v623_v13, 0.0 }
 0x134   : > { %v605_v19 = vpop.f32.mrf.mxu1  ;;  %v717_v62 = vsel %vm701_vm1, %v504_v57, 0.0  ;;  %v815_v15 = vsub.f32 %v719_v61, %v799_v39  ;;  %vm708_vm1 = vcmp.eq.s32.totalorder %v1617_v23, %v1800_v0 }
 0x135   : > { %v793_v20 = vsel %vm777_vm7, %v605_v19, 0.0  ;;  %vm782_vm7 = vcmp.eq.s32.totalorder %v1617_v23, %v1778_v24 }
 0x136   : > { %v809_v21 = vsub.f32 %v713_v18, %v793_v20 }
 0x138   : > { %827 = vadd.xlane.f32.xlu2 %v809_v21  ;;  %v720_v21 = vsel %vm704_vm5, %v1774_v14, 0.0 }
 0x139   : > { %v522_v55 = vpop.f32.mrf.mxu2 }
 0x13a   : > { %v626_v27 = vpop.f32.mrf.mxu3 }
 0x13b   : > { %v507_v40 = vpop.f32.mrf.mxu0  ;;  %v800_v13 = vsel %vm784_vm3, %v626_v27, 0.0  ;;  %v691_v27 = vpop.permute.xlu1 %690  ;;  %vm1127_vm3 = vcmask 39968  }
 0x13c   : > { %v608_v29 = vpop.f32.mrf.mxu1  ;;  %v718_v28 = vsel %vm702_vm6, %v507_v40, 0.0  ;;  %vm709_vm8 = vcmp.eq.s32.totalorder %v1617_v23, %v691_v27 }
 0x13d   : > { %v794_v17 = vsel %vm778_vm9, %v608_v29, 0.0 }
 0x13e   : > { %v810_v31 = vsub.f32 %v714_v30, %v794_v17  ;;  %v771_v30 = vpop.permute.xlu2 %770 }
 0x13f   : > { %vm789_vm9 = vcmp.eq.s32.totalorder %v1617_v23, %v771_v30 }
 0x140   : > { %829 = vadd.xlane.f32.xlu2 %v810_v31  ;;  %v816_v31 = vsub.f32 %v720_v21, %v800_v13 }
 0x141   : > { %v525_v18 = vpop.f32.mrf.mxu2 }
 0x142   : > { %v1786_v34 = vpop.f32.mrf.mxu3 }
 0x143   : > { %v801_v35 = vsel %vm785_vm12, %v1786_v34, 0.0  ;;  %v694_v42 = vpop.permute.xlu1 %693 }
 0x144   : > { %v611_v37 = vpop.f32.mrf.mxu1  ;;  %vm710_vm14 = vcmp.eq.s32.totalorder %v1617_v23, %v694_v42 }
 0x145   : > { %v795_v41 = vsel %vm779_vm11, %v611_v37, 0.0  ;;  %vm707_vm11 = vcmp.eq.s32.totalorder %v1617_v23, %v685_v48 }
 0x146   : > { %v811_v44 = vsub.f32 %v715_v38, %v795_v41  ;;  %v723_v36 = vsel %vm707_vm11, %v522_v55, 0.0 }
 0x148   : > { %831 = vadd.xlane.f32.xlu0 %v811_v44  ;;  %v774_v44 = vpop.permute.xlu2 %773 }
 0x149   : > { %v528_v53 = vpop.f32.mrf.mxu2  ;;  %vm790_vm15 = vcmp.eq.s32.totalorder %v1617_v23, %v774_v44 }
 0x14a   : > { %v632_v46 = vpop.f32.mrf.mxu3  ;;  %v725_v24 = vsel %vm709_vm8, %v528_v53, 0.0 }
 0x14b   : > { %v802_v20 = vsel %vm786_vm4, %v632_v46, 0.0  ;;  %vm1169_vm4 = vcmask 0  }
 0x14c   : > { %v614_v25 = vpop.f32.mrf.mxu1  ;;  %v818_v17 = vsub.f32 %v722_v22, %v802_v20  ;;  %v859_v22 = vsub.f32 0.0, %v1520_v1 }
 0x14d   : > { %v796_v50 = vsel %vm780_vm13, %v614_v25, 0.0  ;;  %vm705_vm13 = vcmp.eq.s32.totalorder %v1617_v23, %v1768_v54  ;;  %v724_v25 = vsel %vm708_vm1, %v525_v18, 0.0 }
 0x14e   : > { %v812_v56 = vsub.f32 %v716_v49, %v796_v50  ;;  %v721_v37 = vsel %vm705_vm13, %v1780_v26, 0.0  ;;  %v855_v50 = vsub.f32 0.0, %v1526_v3 }
 0x14f   : > { %v817_v46 = vsub.f32 %v721_v37, %v801_v35  ;;  %v860_v35 = vsub.f32 0.0, %v1532_v4 }
 0x150   : > { %833 = vadd.xlane.f32.xlu1 %v812_v56 }
 0x152   : > { %v635_v59 = vpop.f32.mrf.mxu3 }
 0x153   : > { %v803_v14 = vsel %vm787_vm10, %v635_v59, 0.0 }
 0x154   : > { %v617_v60 = vpop.f32.mrf.mxu1  ;;  %v819_v41 = vsub.f32 %v723_v36, %v803_v14 }
 0x155   : > { %v797_v11 = vsel %vm781_vm2, %v617_v60, 0.0  ;;  %vm788_vm2 = vcmp.eq.s32.totalorder %v1617_v23, %v768_v47  ;;  %v856_v60 = vsub.f32 0.0, %v1538_v6  ;;  %v1032_v47 = vand.u32 2147483647, %v1538_v6 }
 0x156   : > { %v813_v19 = vsub.f32 %v717_v62, %v797_v11 }
 0x158   : > { %839 = vadd.xlane.f32.xlu1 %v815_v15  ;;  %835 = vadd.xlane.f32.xlu2 %v813_v19  ;;  %v858_v15 = vsub.f32 0.0, %v1535_v5 }
 0x15a   : > { %v638_v51 = vpop.f32.mrf.mxu3 }
 0x15b   : > { %v531_v33 = vpop.f32.mrf.mxu2  ;;  %v804_v26 = vsel %vm788_vm2, %v638_v51, 0.0 }
 0x15c   : > { %v620_v58 = vpop.f32.mrf.mxu1  ;;  %v726_v48 = vsel %vm710_vm14, %v531_v33, 0.0  ;;  %v820_v45 = vsub.f32 %v724_v25, %v804_v26  ;;  %v863_v25 = vsub.f32 0.0, %v1544_v7 }
 0x15d   : > { %v798_v29 = vsel %vm782_vm7, %v620_v58, 0.0 }
 0x15e   : > { %v814_v43 = vsub.f32 %v718_v28, %v798_v29 }
 0x160   : > { %845 = vadd.xlane.f32.xlu1 %v818_v17  ;;  %841 = vadd.xlane.f32.xlu2 %v816_v31  ;;  %v1031_v17 = vand.u32 2147483647, %v1526_v3 }
 0x161   : > { %837 = vadd.xlane.f32.xlu0 %v814_v43 }
 0x162   : > { %v641_v52 = vpop.f32.mrf.mxu3 }
 0x163   : > { %v805_v32 = vsel %vm789_vm9, %v641_v52, 0.0 }
 0x164   : > { %v821_v38 = vsub.f32 %v725_v24, %v805_v32  ;;  %v1063_v24 = vsub.f32 1.0, %v1031_v17 }
 0x168   : > { %851 = vadd.xlane.f32.xlu1 %v821_v38  ;;  %847 = vadd.xlane.f32.xlu2 %v819_v41 }
 0x169   : > { %843 = vadd.xlane.f32.xlu0 %v817_v46 }
 0x16a   : > { %v644_v34 = vpop.f32.mrf.mxu3 }
 0x16b   : > { %v806_v54 = vsel %vm790_vm15, %v644_v34, 0.0 }
 0x16c   : > { %v822_v49 = vsub.f32 %v726_v48, %v806_v54 }
 0x170   : > { %853 = vadd.xlane.f32.xlu2 %v822_v49 }
 0x171   : > { %849 = vadd.xlane.f32.xlu0 %v820_v45  ;;  %v1033_v45 = vand.u32 2147483647, %v1523_v2 }
 0x182   : > { %v824_v55 = vpop.xlane.xlu0 %823 }
 0x183   : > { %v871_v56 = vmul.f32 %v855_v50, %v824_v55  ;;  %v1079_v42 = vmul.f32 %v1063_v24, %v824_v55  ;;  %v1034_v50 = vand.u32 2147483647, %v1535_v5  ;;  %v1992_v5 = vld [vmem:[%s1517_s16 + $0x78] sm:$0xff] }
 0x185   : > { %v903_v57 = vand.u32 2147483647, %v871_v56  ;;  %v887_v36 = vmax.f32 %v871_v56, 0.0  ;;  %v1095_v26 = vmul.f32 %v1079_v42, %v824_v55  ;;  %v861_v56 = vsub.f32 0.0, %v1550_v9 }
 0x187   : > { %v919_v59 = vsub.f32 0.0, %v903_v57  ;;  %v1064_v57 = vsub.f32 1.0, %v1032_v47 }
 0x189   : > { %v935_v39 = vmul.f32 1.442695, %v919_v59  ;;  %v2109_v59 = vand.u32 2147483647, %v1520_v1 }
 0x18b   : > { %1379 = vpow2.f32 %v935_v39 }
 0x191   : > { %v1380_v0 = vpop.eup %1379 }
 0x192   : > { %v967_v19 = vadd.f32 1.0, %v1380_v0 }
 0x194   : > { %1381 = vlog2.f32 %v967_v19 }
 0x19a   : > { %v1382_v30 = vpop.eup %1381 }
 0x19b   : > { %v984_v52 = vmul.f32 0.6931472, %v1382_v30 }
 0x19d   : > { %v1015_v38 = vadd.f32 %v984_v52, %v887_v36 }
 0x19f   : > { %v1047_v34 = vmul.f32 %v1031_v17, %v1015_v38  ;;  %v864_v38 = vsub.f32 0.0, %v1562_v12 }
 0x1a3   : > { %v1830_v61 = vpop.xlane.xlu1 %825 }
 0x1a4   : > { %v1835_v62 = vmul.f32 %v856_v60, %v1830_v61  ;;  %v1111_v60 = vadd.f32 %v1095_v26, %v1047_v34 }
 0x1a6   : > { %v904_v11 = vand.u32 2147483647, %v1835_v62 }
 0x1a8   : > { %v920_v51 = vsub.f32 0.0, %v904_v11 }
 0x1aa   : > { %v937_v21 = vmul.f32 1.442695, %v920_v51  ;;  %v1065_v51 = vsub.f32 1.0, %v1033_v45 }
 0x1ab   : > { %v1832_v23 = vpop.xlane.xlu2 %827 }
 0x1ac   : > { %v1841_v18 = vmul.f32 %v857_v63, %v1832_v23  ;;  %1383 = vpow2.f32 %v937_v21 }
 0x1ae   : > { %v905_v20 = vand.u32 2147483647, %v1841_v18 }
 0x1b0   : > { %v921_v28 = vsub.f32 0.0, %v905_v20  ;;  %v1066_v20 = vsub.f32 1.0, %v1034_v50 }
 0x1b2   : > { %v939_v43 = vmul.f32 1.442695, %v921_v28  ;;  %v1384_v37 = vpop.eup %1383  ;;  %v1067_v28 = vsub.f32 1.0, %v2109_v59 }
 0x1b3   : > { %v1843_v40 = vpop.xlane.xlu2 %829  ;;  %v968_v46 = vadd.f32 1.0, %v1384_v37 }
 0x1b4   : > { %v1846_v13 = vmul.f32 %v858_v15, %v1843_v40  ;;  %1385 = vpow2.f32 %v939_v43  ;;  %v1894_v43 = vsel %vm1127_vm3, %v1111_v60, 0.0 }
 0x1b6   : > { %v906_v58 = vand.u32 2147483647, %v1846_v13 }
 0x1b8   : > { %v922_v29 = vsub.f32 0.0, %v906_v58  ;;  %v2108_v58 = vand.u32 2147483647, %v1532_v4 }
 0x1ba   : > { %v941_v14 = vmul.f32 1.442695, %v922_v29  ;;  %v1386_v54 = vpop.eup %1385  ;;  %v2106_v29 = vand.u32 2147483647, %v1544_v7  ;;  %v1902_v36 = vsub.f32 1.0, %v2108_v58 }
 0x1bb   : > { %v1851_v27 = vpop.xlane.xlu0 %831  ;;  %v969_v63 = vadd.f32 1.0, %v1386_v54  ;;  %v1081_v54 = vmul.f32 %v1065_v51, %v1832_v23 }
 0x1bc   : > { %v1855_v31 = vmul.f32 %v859_v22, %v1851_v27  ;;  %1387 = vpow2.f32 %v941_v14  ;;  %v1080_v22 = vmul.f32 %v1064_v57, %v1830_v61  ;;  %v862_v57 = vsub.f32 0.0, %v1547_v8 }
 0x1be   : > { %v907_v53 = vand.u32 2147483647, %v1855_v31 }
 0x1c0   : > { %v923_v32 = vsub.f32 0.0, %v907_v53  ;;  %v2107_v53 = vand.u32 2147483647, %v1550_v9 }
 0x1c2   : > { %v943_v41 = vmul.f32 1.442695, %v923_v32  ;;  %v1388_v49 = vpop.eup %1387  ;;  %v866_v32 = vsub.f32 0.0, %v1556_v10 }
 0x1c3   : > { %v1859_v3 = vpop.xlane.xlu1 %833  ;;  %v970_v11 = vadd.f32 1.0, %v1388_v49 }
 0x1c4   : > { %v1862_v44 = vmul.f32 %v860_v35, %v1859_v3  ;;  %1389 = vpow2.f32 %v943_v41  ;;  %v888_v35 = vmax.f32 %v1835_v62, 0.0  ;;  %v1913_v62 = vsub.f32 1.0, %v2107_v53 }
 0x1c5   : > { %1391 = vlog2.f32 %v968_v46  ;;  %v1096_v46 = vmul.f32 %v1080_v22, %v1830_v61  ;;  %v889_v61 = vmax.f32 %v1841_v18, 0.0  ;;  %v1082_v18 = vmul.f32 %v1066_v20, %v1843_v40 }
 0x1c6   : > { %v908_v33 = vand.u32 2147483647, %v1862_v44 }
 0x1c8   : > { %v924_v48 = vsub.f32 0.0, %v908_v33  ;;  %v1908_v33 = vsub.f32 1.0, %v2106_v29 }
 0x1ca   : > { %v945_v39 = vmul.f32 1.442695, %v924_v48  ;;  %v1390_v19 = vpop.eup %1389 }
 0x1cb   : > { %v1873_v55 = vpop.xlane.xlu1 %839  ;;  %v1875_v0 = vpop.xlane.xlu2 %835  ;;  %v971_v14 = vadd.f32 1.0, %v1390_v19 }
 0x1cc   : > { %1393 = vpow2.f32 %v945_v39  ;;  %v1878_v15 = vmul.f32 %v863_v25, %v1873_v55  ;;  %v1886_v21 = vmul.f32 %v861_v56, %v1875_v0  ;;  %v1392_v17 = vpop.eup %1391  ;;  %v2104_v25 = vand.u32 2147483647, %v1562_v12 }
 0x1cd   : > { %1395 = vlog2.f32 %v969_v63  ;;  %v986_v42 = vmul.f32 0.6931472, %v1392_v17  ;;  %v1934_v17 = vmul.f32 %v1081_v54, %v1832_v23  ;;  %v1098_v54 = vmul.f32 %v1082_v18, %v1843_v40 }
 0x1ce   : > { %v911_v30 = vand.u32 2147483647, %v1878_v15  ;;  %v909_v52 = vand.u32 2147483647, %v1886_v21  ;;  %1397 = vlog2.f32 %v970_v11 }
 0x1cf   : > { %1399 = vlog2.f32 %v971_v14  ;;  %v1016_v22 = vadd.f32 %v986_v42, %v888_v35 }
 0x1d0   : > { %v927_v24 = vsub.f32 0.0, %v911_v30  ;;  %v925_v37 = vsub.f32 0.0, %v909_v52  ;;  %v1938_v52 = vsub.f32 1.0, %v2104_v25 }
 0x1d2   : > { %v1394_v41 = vpop.eup %1393  ;;  %v951_v34 = vmul.f32 1.442695, %v927_v24  ;;  %v947_v26 = vmul.f32 1.442695, %v925_v37  ;;  %v2105_v24 = vand.u32 2147483647, %v1547_v8 }
 0x1d3   : > { %v1915_v48 = vpop.xlane.xlu1 %845  ;;  %v1918_v49 = vpop.xlane.xlu2 %841  ;;  %v972_v63 = vadd.f32 1.0, %v1394_v41  ;;  %v890_v37 = vmax.f32 %v1846_v13, 0.0  ;;  %v869_v41 = vsub.f32 0.0, %v1589_v16  ;;  %v1959_v16 = vld [vmem:[%s1517_s16 + $0x60] sm:$0xff] }
 0x1d4   : > { %v1922_v56 = vmul.f32 %v866_v32, %v1915_v48  ;;  %v1925_v39 = vpop.xlane.xlu0 %837  ;;  %v1396_v60 = vpop.eup %1395  ;;  %1401 = vpow2.f32 %v951_v34  ;;  %v1929_v19 = vmul.f32 %v864_v38, %v1918_v49  ;;  %v1048_v34 = vmul.f32 %v1032_v47, %v1016_v22 }
 0x1d5   : > { %v1398_v51 = vpop.eup %1397  ;;  %1403 = vpow2.f32 %v947_v26  ;;  %v988_v32 = vmul.f32 0.6931472, %v1396_v60  ;;  %v1944_v20 = vmul.f32 %v862_v57, %v1925_v39  ;;  %v867_v6 = vsub.f32 0.0, %v1959_v16 }
 0x1d6   : > { %v914_v30 = vand.u32 2147483647, %v1922_v56  ;;  %v912_v14 = vand.u32 2147483647, %v1929_v19  ;;  %v990_v38 = vmul.f32 0.6931472, %v1398_v51  ;;  %1405 = vlog2.f32 %v972_v63  ;;  %v1400_v42 = vpop.eup %1399 }
 0x1d7   : > { %v910_v13 = vand.u32 2147483647, %v1944_v20  ;;  %v1954_v63 = vsub.f32 1.0, %v2105_v24  ;;  %v1017_v22 = vadd.f32 %v988_v32, %v889_v61  ;;  %v1112_v29 = vadd.f32 %v1096_v46, %v1048_v34 }
 0x1d8   : > { %v930_v35 = vsub.f32 0.0, %v914_v30  ;;  %v928_v23 = vsub.f32 0.0, %v912_v14  ;;  %v1083_v30 = vmul.f32 %v1067_v28, %v1851_v27  ;;  %v1965_v14 = vld [vmem:[%s1517_s16 + $0x50] sm:$0xff]  ;;  %v992_v32 = vmul.f32 0.6931472, %v1400_v42 }
 0x1d9   : > { %v926_v18 = vsub.f32 0.0, %v910_v13  ;;  %v865_v28 = vsub.f32 0.0, %v1965_v14 }
 0x1da   : > { %v957_v26 = vmul.f32 1.442695, %v930_v35  ;;  %v1402_v60 = vpop.eup %1401  ;;  %v953_v57 = vmul.f32 1.442695, %v928_v23  ;;  %v1018_v23 = vadd.f32 %v990_v38, %v890_v37  ;;  %v1049_v37 = vmul.f32 %v1033_v45, %v1017_v22  ;;  %v2001_v22 = vld [vmem:[%s1517_s16 + $0x68] sm:$0xff] }
 0x1db   : > { %v1956_v51 = vpop.xlane.xlu1 %851  ;;  %v1962_v47 = vpop.xlane.xlu2 %847  ;;  %v975_v53 = vadd.f32 1.0, %v1402_v60  ;;  %v949_v58 = vmul.f32 1.442695, %v926_v18  ;;  %v891_v38 = vmax.f32 %v1855_v31, 0.0  ;;  %v1084_v45 = vmul.f32 %v1902_v36, %v1859_v3 }
 0x1dc   : > { %v1404_v40 = vpop.eup %1403  ;;  %1407 = vpow2.f32 %v957_v26  ;;  %v1970_v11 = vmul.f32 %v869_v41, %v1956_v51  ;;  %v1972_v24 = vpop.xlane.xlu0 %843  ;;  %v1976_v59 = vmul.f32 %v867_v6, %v1962_v47  ;;  %v1099_v41 = vmul.f32 %v1083_v30, %v1851_v27 }
 0x1dd   : > { %v973_v25 = vadd.f32 1.0, %v1404_v40  ;;  %1409 = vpow2.f32 %v953_v57  ;;  %v1406_v61 = vpop.eup %1405  ;;  %v1050_v46 = vmul.f32 %v1034_v50, %v1018_v23  ;;  %v1986_v42 = vmul.f32 %v865_v28, %v1972_v24 }
 0x1de   : > { %v917_v13 = vand.u32 2147483647, %v1970_v11  ;;  %v1129_v26 = vsel %vm1127_vm3, %v1112_v29, 0.0  ;;  %v994_v2 = vmul.f32 0.6931472, %v1406_v61  ;;  %v1019_v27 = vadd.f32 %v992_v32, %v891_v38 }
 0x1df   : > { %1411 = vlog2.f32 %v973_v25  ;;  %v915_v25 = vand.u32 2147483647, %v1976_v59  ;;  %v870_v50 = vsub.f32 0.0, %v1992_v5  ;;  %v1113_v57 = vadd.f32 %v1934_v17, %v1049_v37 }
 0x1e0   : > { %1413 = vpow2.f32 %v949_v58  ;;  %v933_v34 = vsub.f32 0.0, %v917_v13  ;;  %v892_v6 = vmax.f32 %v1862_v44, 0.0  ;;  %v913_v29 = vand.u32 2147483647, %v1986_v42 }
 0x1e1   : > { %1415 = vlog2.f32 %v975_v53  ;;  %v931_v60 = vsub.f32 0.0, %v915_v25  ;;  %v868_v53 = vsub.f32 0.0, %v2001_v22  ;;  %v1114_v18 = vadd.f32 %v1098_v54, %v1050_v46 }
 0x1e2   : > { %v1408_v31 = vpop.eup %1407  ;;  %v963_v58 = vmul.f32 1.442695, %v933_v34  ;;  %v893_v28 = vmax.f32 %v1886_v21, 0.0  ;;  %v1020_v13 = vadd.f32 %v994_v2, %v892_v6  ;;  %v929_v17 = vsub.f32 0.0, %v913_v29 }
 0x1e3   : > { %v1410_v30 = vpop.eup %1409  ;;  %v1998_v40 = vpop.xlane.xlu2 %853  ;;  %v959_v61 = vmul.f32 1.442695, %v931_v60  ;;  %v2110_v44 = vand.u32 2147483647, %v1520_v1  ;;  %v1131_v21 = vsel %vm1127_vm3, %v1113_v57, 0.0  ;;  %v1085_v2 = vmul.f32 %v1913_v62, %v1875_v0 }
 0x1e4   : > { %v976_v23 = vadd.f32 1.0, %v1410_v30  ;;  %1417 = vpow2.f32 %v963_v58  ;;  %v2008_v25 = vmul.f32 %v870_v50, %v1998_v40  ;;  %v2010_v35 = vpop.xlane.xlu0 %849  ;;  %v955_v60 = vmul.f32 1.442695, %v929_v17 }
 0x1e5   : > { %v1412_v36 = vpop.eup %1411  ;;  %v1051_v37 = vmul.f32 %v2110_v44, %v1019_v27  ;;  %v978_v58 = vadd.f32 1.0, %v1408_v31  ;;  %v1130_v27 = vadd.f32 %v1129_v26, %v1894_v43  ;;  %v2111_v50 = vand.u32 2147483647, %v1532_v4 }
 0x1e6   : > { %v1414_v32 = vpop.eup %1413  ;;  %v996_v38 = vmul.f32 0.6931472, %v1412_v36  ;;  %1419 = vlog2.f32 %v976_v23  ;;  %v918_v1 = vand.u32 2147483647, %v2008_v25  ;;  %v2020_v6 = vmul.f32 %v868_v53, %v2010_v35 }
 0x1e7   : > { %v974_v34 = vadd.f32 1.0, %v1414_v32  ;;  %v1416_v54 = vpop.eup %1415  ;;  %1421 = vpow2.f32 %v959_v61  ;;  %v1052_v30 = vmul.f32 %v2111_v50, %v1020_v13  ;;  %v1133_v57 = vsel %vm1127_vm3, %v1114_v18, 0.0 }
 0x1e8   : > { %v1021_v46 = vadd.f32 %v996_v38, %v893_v28  ;;  %v1115_v29 = vadd.f32 %v1099_v41, %v1051_v37  ;;  %v1000_v36 = vmul.f32 0.6931472, %v1416_v54  ;;  %v934_v28 = vsub.f32 0.0, %v918_v1 }
 0x1e9   : > { %1423 = vlog2.f32 %v974_v34  ;;  %v1132_v62 = vadd.f32 %v1131_v21, %v1130_v27  ;;  %v1100_v31 = vmul.f32 %v1084_v45, %v1859_v3  ;;  %v895_v61 = vmax.f32 %v1878_v15, 0.0 }
 0x1ea   : > { %1425 = vpow2.f32 %v955_v60  ;;  %v1418_v23 = vpop.eup %1417  ;;  %v2112_v43 = vand.u32 2147483647, %v1550_v9  ;;  %v1101_v32 = vmul.f32 %v1085_v2, %v1875_v0  ;;  %v965_v53 = vmul.f32 1.442695, %v934_v28 }
 0x1eb   : > { %1427 = vlog2.f32 %v978_v58  ;;  %v916_v13 = vand.u32 2147483647, %v2020_v6  ;;  %v1134_v41 = vadd.f32 %v1133_v57, %v1132_v62  ;;  %v1116_v38 = vadd.f32 %v1100_v31, %v1052_v30 }
 0x1ec   : > { %v1053_v26 = vmul.f32 %v2112_v43, %v1021_v46  ;;  %v1420_v4 = vpop.eup %1419  ;;  %v894_v17 = vmax.f32 %v1944_v20, 0.0  ;;  %v1086_v3 = vmul.f32 %v1954_v63, %v1925_v39  ;;  %v1135_v15 = vsel %vm1127_vm3, %v1115_v29, 0.0 }
 0x1ed   : > { %v1422_v18 = vpop.eup %1421  ;;  %v1023_v9 = vadd.f32 %v1000_v36, %v895_v61  ;;  %v932_v37 = vsub.f32 0.0, %v916_v13  ;;  %v1002_v54 = vmul.f32 0.6931472, %v1420_v4  ;;  %1429 = vpow2.f32 %v965_v53  ;;  %v1447_v13 = vld [vmem:[%s1517_s16 + $0x70] sm:$0xff] }
 0x1ee   : > { %v979_v44 = vadd.f32 1.0, %v1422_v18  ;;  %v1117_v0 = vadd.f32 %v1101_v32, %v1053_v26  ;;  %v981_v46 = vadd.f32 1.0, %v1418_v23  ;;  %v1137_v20 = vsel %vm1127_vm3, %v1116_v38, 0.0 }
 0x1ef   : > { %v1424_v45 = vpop.eup %1423  ;;  %v961_v2 = vmul.f32 1.442695, %v932_v37  ;;  %v1087_v63 = vmul.f32 %v1908_v33, %v1873_v55  ;;  %v896_v58 = vmax.f32 %v1929_v19, 0.0  ;;  %v1136_v50 = vadd.f32 %v1135_v15, %v1134_v41 }
 0x1f0   : > { %v1426_v34 = vpop.eup %1425  ;;  %v998_v21 = vmul.f32 0.6931472, %v1424_v45  ;;  %1431 = vlog2.f32 %v979_v44  ;;  %v2113_v30 = vand.u32 2147483647, %v1544_v7  ;;  %v1102_v29 = vmul.f32 %v1086_v3, %v1925_v39 }
 0x1f1   : > { %v977_v60 = vadd.f32 1.0, %v1426_v34  ;;  %v1428_v27 = vpop.eup %1427  ;;  %v1139_v36 = vsel %vm1127_vm3, %v1117_v0, 0.0  ;;  %v1024_v28 = vadd.f32 %v1002_v54, %v896_v58  ;;  %v2114_v23 = vand.u32 2147483647, %v1547_v8 }
 0x1f2   : > { %v1022_v1 = vadd.f32 %v998_v21, %v894_v17  ;;  %v1055_v57 = vmul.f32 %v2113_v30, %v1023_v9  ;;  %v1138_v33 = vadd.f32 %v1137_v20, %v1136_v50  ;;  %v1088_v19 = vmul.f32 %v1938_v52, %v1918_v49 }
 0x1f3   : > { %1433 = vlog2.f32 %v977_v60  ;;  %v2115_v31 = vand.u32 2147483647, %v1965_v14  ;;  %v1430_v61 = vpop.eup %1429  ;;  %v1103_v39 = vmul.f32 %v1087_v63, %v1873_v55  ;;  %v2116_v43 = vand.u32 2147483647, %v1556_v10 }
 0x1f4   : > { %v1054_v62 = vmul.f32 %v2114_v23, %v1022_v1  ;;  %1435 = vpow2.f32 %v961_v2  ;;  %v1006_v4 = vmul.f32 0.6931472, %v1428_v27  ;;  %v1140_v8 = vadd.f32 %v1139_v36, %v1138_v33 }
 0x1f5   : > { %1437 = vlog2.f32 %v981_v46  ;;  %v1073_v7 = vsub.f32 1.0, %v2115_v31  ;;  %v1074_v26 = vsub.f32 1.0, %v2116_v43  ;;  %v1045_v18 = vand.u32 2147483647, %v1447_v13 }
 0x1f6   : > { %v1118_v32 = vadd.f32 %v1102_v29, %v1054_v62  ;;  %v1432_v53 = vpop.eup %1431  ;;  %v1043_v41 = vand.u32 2147483647, %v1959_v16  ;;  %v982_v38 = vadd.f32 1.0, %v1430_v61  ;;  %v1119_v52 = vadd.f32 %v1103_v39, %v1055_v57 }
 0x1f7   : > { %v898_v17 = vmax.f32 %v1922_v56, 0.0  ;;  %v2117_v3 = vand.u32 2147483647, %v1562_v12  ;;  %v1104_v9 = vmul.f32 %v1088_v19, %v1918_v49  ;;  %v1089_v37 = vmul.f32 %v1073_v7, %v1972_v24 }
 0x1f8   : > { %v1141_v55 = vsel %vm1127_vm3, %v1118_v32, 0.0  ;;  %1439 = vlog2.f32 %v982_v38  ;;  %v1008_v54 = vmul.f32 0.6931472, %v1432_v53  ;;  %v897_v16 = vmax.f32 %v1986_v42, 0.0 }
 0x1f9   : > { %v1056_v45 = vmul.f32 %v2117_v3, %v1024_v28  ;;  %v1434_v15 = vpop.eup %1433  ;;  %v1142_v44 = vadd.f32 %v1141_v55, %v1140_v8  ;;  %v1026_v0 = vadd.f32 %v1006_v4, %v898_v17  ;;  %v1090_v56 = vmul.f32 %v1074_v26, %v1915_v48 }
 0x1fa   : > { %v1436_v34 = vpop.eup %1435  ;;  %v1004_v21 = vmul.f32 0.6931472, %v1434_v15  ;;  %v1075_v12 = vsub.f32 1.0, %v1043_v41  ;;  %v1044_v60 = vand.u32 2147483647, %v2001_v22  ;;  %v1143_v20 = vsel %vm1127_vm3, %v1119_v52, 0.0 }
 0x1fb   : > { %v1438_v46 = vpop.eup %1437  ;;  %v980_v2 = vadd.f32 1.0, %v1436_v34  ;;  %v1120_v49 = vadd.f32 %v1104_v9, %v1056_v45  ;;  %v899_v63 = vmax.f32 %v1976_v59, 0.0  ;;  %v1144_v1 = vadd.f32 %v1143_v20, %v1142_v44 }
 0x1fc   : > { %v1025_v58 = vadd.f32 %v1004_v21, %v897_v16  ;;  %v1105_v27 = vmul.f32 %v1089_v37, %v1972_v24  ;;  %v1046_v50 = vand.u32 2147483647, %v1992_v5  ;;  %v2118_v42 = vmov %v2116_v43 }
 0x1fd   : > { %1441 = vlog2.f32 %v980_v2  ;;  %v1058_v30 = vmul.f32 %v2118_v42, %v1026_v0  ;;  %v1012_v57 = vmul.f32 0.6931472, %v1438_v46  ;;  %v1027_v29 = vadd.f32 %v1008_v54, %v899_v63 }
 0x1fe   : > { %v2119_v22 = vmov %v2115_v31  ;;  %v1440_v28 = vpop.eup %1439  ;;  %v1106_v23 = vmul.f32 %v1090_v56, %v1915_v48  ;;  %v1077_v62 = vsub.f32 1.0, %v1045_v18  ;;  %v1091_v59 = vmul.f32 %v1075_v12, %v1962_v47 }
 0x1ff   : > { %v1057_v36 = vmul.f32 %v2119_v22, %v1025_v58  ;;  %v1076_v33 = vsub.f32 1.0, %v1044_v60  ;;  %v1145_v24 = vsel %vm1127_vm3, %v1120_v49, 0.0  ;;  %v901_v5 = vmax.f32 %v1970_v11, 0.0 }
 0x200   : > { %v1014_v31 = vmul.f32 0.6931472, %v1440_v28  ;;  %v1146_v10 = vadd.f32 %v1145_v24, %v1144_v1  ;;  %v1078_v7 = vsub.f32 1.0, %v1046_v50  ;;  %v902_v61 = vmax.f32 %v2008_v25, 0.0 }
 0x201   : > { %v1121_v19 = vadd.f32 %v1105_v27, %v1057_v36  ;;  %v1122_v39 = vadd.f32 %v1106_v23, %v1058_v30  ;;  %v1029_v14 = vadd.f32 %v1012_v57, %v901_v5  ;;  %v1059_v43 = vmul.f32 %v1043_v41, %v1027_v29 }
 0x202   : > { %v1093_v4 = vmul.f32 %v1077_v62, %v1956_v51  ;;  %v1107_v32 = vmul.f32 %v1091_v59, %v1962_v47  ;;  %v1030_v8 = vadd.f32 %v1014_v31, %v902_v61  ;;  %v900_v11 = vmax.f32 %v2020_v6, 0.0 }
 0x203   : > { %v1147_v26 = vsel %vm1127_vm3, %v1121_v19, 0.0  ;;  %v1442_v48 = vpop.eup %1441  ;;  %v1092_v38 = vmul.f32 %v1076_v33, %v2010_v35  ;;  %v1094_v52 = vmul.f32 %v1078_v7, %v1998_v40  ;;  %v1149_v25 = vsel %vm1127_vm3, %v1122_v39, 0.0 }
 0x204   : > { %v1148_v53 = vadd.f32 %v1147_v26, %v1146_v10  ;;  %v1010_v13 = vmul.f32 0.6931472, %v1442_v48  ;;  %v1061_v17 = vmul.f32 %v1045_v18, %v1029_v14  ;;  %v1123_v41 = vadd.f32 %v1107_v32, %v1059_v43 }
 0x205   : > { %v1109_v55 = vmul.f32 %v1093_v4, %v1956_v51  ;;  %v1062_v15 = vmul.f32 %v1046_v50, %v1030_v8  ;;  %v1108_v47 = vmul.f32 %v1092_v38, %v2010_v35  ;;  %v1110_v37 = vmul.f32 %v1094_v52, %v1998_v40 }
 0x206   : > { %v1028_v3 = vadd.f32 %v1010_v13, %v900_v11  ;;  %v1150_v45 = vadd.f32 %v1149_v25, %v1148_v53  ;;  %v1151_v6 = vsel %vm1127_vm3, %v1123_v41, 0.0 }
 0x207   : > { %v1125_v44 = vadd.f32 %v1109_v55, %v1061_v17  ;;  %v1126_v54 = vadd.f32 %v1110_v37, %v1062_v15 }
 0x208   : > { %v1060_v9 = vmul.f32 %v1044_v60, %v1028_v3  ;;  %v1152_v0 = vadd.f32 %v1151_v6, %v1150_v45 }
 0x209   : > { %v1155_v21 = vsel %vm1127_vm3, %v1125_v44, 0.0  ;;  %v1157_v51 = vsel %vm1127_vm3, %v1126_v54, 0.0 }
 0x20a   : > { %v1124_v34 = vadd.f32 %v1108_v47, %v1060_v9 }
 0x20c   : > { %v1153_v18 = vsel %vm1127_vm3, %v1124_v34, 0.0 }
 0x20d   : > { %v1154_v16 = vadd.f32 %v1153_v18, %v1152_v0 }
 0x20f   : > { %v1156_v46 = vadd.f32 %v1155_v21, %v1154_v16 }
 0x211   : > { %v1158_v56 = vadd.f32 %v1157_v51, %v1156_v46 }
 0x213   : > { %v1159_v12 = vrot.slane %v1158_v56, 4 }
 0x215   : > { %v1160_v35 = vadd.f32 %v1159_v12, %v1158_v56 }
 0x217   : > { %v1161_v60 = vrot.slane %v1160_v35, 2 }
 0x219   : > { %v1162_v2 = vadd.f32 %v1161_v60, %v1160_v35 }
 0x21b   : > { %v1163_v20 = vrot.slane %v1162_v2, 1 }
 0x21d   : > { %v1164_v49 = vadd.f32 %v1163_v20, %v1162_v2 }
 0x21f   : > { %1166 = vrot.lane.b32.xlu0 %v1164_v49, %s1477_s21 }
 0x291   : > { %v1167_v40 = vpop.permute.xlu0 %1166 }
 0x292   : > { %1170 = vst.msk [vmem:[%s192_s24] sm:$0x1] %vm1169_vm4, %v1167_v40 }
 0x293 PF: > { %s12_s11 = sadd.s32 1, %s1470_s11   ;;  %s2120_s9 = smov %s1466_s10 }
 0x294   : > { %p9_p5 = scmp.ge.s32.totalorder %s12_s11, 4   ;;  %s2121_s10 = smov %s2123_s12 }
 0x296   :  { %11 = sbr.rel (!%p9_p5) target bundleno = 2 (0x2), region = 61 }

</bundles_post_ra>
